<compile_context>
chip_gen: v7x
topology: tpu7x:2x2x1
jax: 0.10.0
libtpu: 0.0.40
codegen_flags: <defaults>
</compile_context>

<pallas_src>
import functools

import jax
import jax.numpy as jnp
from jax.experimental import pallas as pl
from jax.experimental.pallas import tpu as pltpu


def _round_up(x, m):
    return ((x + m - 1) // m) * m


def _pick_tile(total, want):
    """Largest multiple of 128 that divides `total` and is <= want (min 128)."""
    best = 128
    t = 128
    while t <= total:
        if total % t == 0 and t <= want:
            best = t
        t += 128
    return best


def _stage1_bytes(tm1, tn1, d_in_p):
    x_tile = tm1 * d_in_p * 4 * 2      # f32, double-buffered
    w_tile = d_in_p * tn1 * 4 * 2      # f32, double-buffered
    o_tile = tm1 * tn1 * 2 * 2         # bf16, double-buffered
    return x_tile + w_tile + o_tile


def _stage2_bytes(tm, tk, d_out_p):
    adj_tile = tm * tk * 2 * 2         # bf16, double-buffered
    hw_panel = tk * d_out_p * 2 * 2    # bf16, double-buffered
    out_tile = tm * d_out_p * 4 * 2    # f32, double-buffered
    acc = tm * d_out_p * 4             # f32 scratch accumulator
    vecs = 3 * d_out_p * 4 * 2         # bias / gamma / beta
    return adj_tile + hw_panel + out_tile + acc + vecs


# ---------- Stage 1: hw = x @ W_fused  (W_fused = W_lin @ W_gcn), bf16 output ----------
def _xw_kernel(x_ref, w_ref, hw_ref):
    hw_ref[...] = jnp.dot(
        x_ref[...], w_ref[...], preferred_element_type=jnp.float32
    ).astype(hw_ref.dtype)


# ---------- Stage 2: out = relu(LN(adj @ hw + b) * gamma + beta) -----------------------
def _adj_ln_relu_kernel(adj_ref, hw_ref, b_ref, gamma_ref, beta_ref,
                        o_ref, acc_ref, *, d_out, eps, mask_lanes):
    k = pl.program_id(1)

    @pl.when(k == 0)
    def _():
        acc_ref[...] = jnp.zeros_like(acc_ref)

    acc_ref[...] += jnp.dot(adj_ref[...], hw_ref[...],
                            preferred_element_type=jnp.float32)

    @pl.when(k == pl.num_programs(1) - 1)
    def _():
        h = acc_ref[...] + b_ref[...]                       # GCNConv bias
        tm, dp = h.shape
        inv_d = 1.0 / d_out
        if mask_lanes:
            # Exclude lane padding (features >= d_out) from LayerNorm statistics.
            feat_mask = jax.lax.broadcasted_iota(jnp.int32, (tm, dp), 1) < d_out
            hm = jnp.where(feat_mask, h, 0.0)
            mean = jnp.sum(hm, axis=-1, keepdims=True) * inv_d
            centered = jnp.where(feat_mask, h - mean, 0.0)
        else:
            mean = jnp.sum(h, axis=-1, keepdims=True) * inv_d
            centered = h - mean
        var = jnp.sum(centered * centered, axis=-1, keepdims=True) * inv_d
        hn = centered * jax.lax.rsqrt(var + eps)            # rsqrt -> EUP slot
        hn = hn * gamma_ref[...] + beta_ref[...]            # LN affine
        o_ref[...] = jnp.maximum(hn, 0.0).astype(o_ref.dtype)   # ReLU


def euc_gc_layer(x, adj, w_lin, w_gcn, b_gcn, gamma, beta,
                 *, tm=256, tk=512, eps=1e-5):
    n, d_in = x.shape
    d_out = w_lin.shape[1]

    # Algebraic fusion of the two static per-layer weights: (x @ A) @ B == x @ (A @ B).
    w_fused = jnp.dot(w_lin.astype(jnp.float32), w_gcn.astype(jnp.float32))

    # Lane-dense feature padding and node padding to the tile grid.
    d_in_p = _round_up(d_in, 128)
    d_out_p = _round_up(d_out, 128)
    n_p = _round_up(n, 128)

    vmem_budget = 24 * 1024 * 1024     # tile working-set budget (conservative for v7x)
    vmem_limit = 48 * 1024 * 1024      # scoped-VMEM limit passed to Mosaic

    # Stage-2 tile selection (tiles always divide n_p and are 128-multiples).
    tm = _pick_tile(n_p, tm)
    tk = _pick_tile(n_p, tk)
    while _stage2_bytes(tm, tk, d_out_p) > vmem_budget and tk > 128:
        tk = _pick_tile(n_p, tk - 128)
    while _stage2_bytes(tm, tk, d_out_p) > vmem_budget and tm > 128:
        tm = _pick_tile(n_p, tm - 128)

    # Stage-1 tile selection. d_in is not tiled (fine for typical GCN widths).
    tm1 = _pick_tile(n_p, 512)
    tn1 = _pick_tile(d_out_p, 512)
    while _stage1_bytes(tm1, tn1, d_in_p) > vmem_budget and tn1 > 128:
        tn1 = _pick_tile(d_out_p, tn1 - 128)
    while _stage1_bytes(tm1, tn1, d_in_p) > vmem_budget and tm1 > 128:
        tm1 = _pick_tile(n_p, tm1 - 128)

    x_p = jnp.zeros((n_p, d_in_p), jnp.float32).at[:n, :d_in].set(
        x.astype(jnp.float32))
    adj_p = jnp.zeros((n_p, n_p), jnp.bfloat16).at[:n, :n].set(
        adj.astype(jnp.bfloat16))
    w_p = jnp.zeros((d_in_p, d_out_p), jnp.float32).at[:d_in, :d_out].set(w_fused)
    b_p = jnp.zeros((1, d_out_p), jnp.float32).at[:, :d_out].set(
        jnp.reshape(b_gcn, (1, d_out)).astype(jnp.float32))
    gamma_p = jnp.zeros((1, d_out_p), jnp.float32).at[:, :d_out].set(
        jnp.reshape(gamma, (1, d_out)).astype(jnp.float32))
    beta_p = jnp.zeros((1, d_out_p), jnp.float32).at[:, :d_out].set(
        jnp.reshape(beta, (1, d_out)).astype(jnp.float32))

    # Stage 1: hw = x @ W_fused, bf16 output feeds the adj matmul.
    hw = pl.pallas_call(
        _xw_kernel,
        out_shape=jax.ShapeDtypeStruct((n_p, d_out_p), jnp.bfloat16),
        grid=(n_p // tm1, d_out_p // tn1),
        in_specs=[
            pl.BlockSpec((tm1, d_in_p), lambda i, j: (i, 0)),
            pl.BlockSpec((d_in_p, tn1), lambda i, j: (0, j)),
        ],
        out_specs=pl.BlockSpec((tm1, tn1), lambda i, j: (i, j)),
        compiler_params=pltpu.CompilerParams(
            dimension_semantics=("parallel", "parallel"),
            vmem_limit_bytes=vmem_limit,
        ),
        cost_estimate=pl.CostEstimate(
            flops=2 * n_p * d_in_p * d_out_p,
            transcendentals=0,
            bytes_accessed=n_p * d_in_p * 4 + d_in_p * d_out_p * 4
            + n_p * d_out_p * 2,
        ),
    )(x_p, w_p)

    # Stage 2: adj @ hw with k-reduction last, fused bias + LN + ReLU epilogue.
    kernel = functools.partial(
        _adj_ln_relu_kernel, d_out=d_out, eps=eps, mask_lanes=(d_out_p != d_out))
    out_p = pl.pallas_call(
        kernel,
        out_shape=jax.ShapeDtypeStruct((n_p, d_out_p), jnp.float32),
        grid=(n_p // tm, n_p // tk),
        in_specs=[
            pl.BlockSpec((tm, tk), lambda i, k: (i, k)),        # adj tile (bf16)
            pl.BlockSpec((tk, d_out_p), lambda i, k: (k, 0)),   # hw k-panel (bf16)
            pl.BlockSpec((1, d_out_p), lambda i, k: (0, 0)),    # b_gcn (resident)
            pl.BlockSpec((1, d_out_p), lambda i, k: (0, 0)),    # gamma (resident)
            pl.BlockSpec((1, d_out_p), lambda i, k: (0, 0)),    # beta  (resident)
        ],
        out_specs=pl.BlockSpec((tm, d_out_p), lambda i, k: (i, 0)),
        scratch_shapes=[pltpu.VMEM((tm, d_out_p), jnp.float32)],
        compiler_params=pltpu.CompilerParams(
            dimension_semantics=("parallel", "arbitrary"),
            vmem_limit_bytes=vmem_limit,
        ),
        cost_estimate=pl.CostEstimate(
            flops=2 * n_p * n_p * d_out_p,
            transcendentals=n_p,
            bytes_accessed=n_p * n_p * 2
            + (n_p // tm) * n_p * d_out_p * 2
            + n_p * d_out_p * 4,
        ),
    )(adj_p, hw, b_p, gamma_p, beta_p)

    return out_p[:n, :d_out]


def reference(x, adj, w_lin, w_gcn, b_gcn, gamma, beta):
    h = x @ w_lin
    h = adj @ (h @ w_gcn) + b_gcn
    mean = jnp.mean(h, axis=-1, keepdims=True)
    var = jnp.mean(jnp.square(h - mean), axis=-1, keepdims=True)
    h = (h - mean) / jnp.sqrt(var + 1e-5)
    h = h * gamma + beta
    return jnp.maximum(h, 0.0)


if __name__ == "__main__":
    N, D_IN, D_OUT = 16, 32, 32

    key = jax.random.PRNGKey(0)
    kx, kadj, kwl, kwg, kb, kg, kbt = jax.random.split(key, 7)

    # Inputs
    x = jax.random.normal(kx, (N, D_IN), dtype=jnp.float32)
    # Symmetric row-normalized dense adjacency with self-loops.
    a = (jax.random.uniform(kadj, (N, N)) > 0.7).astype(jnp.float32)
    a = jnp.maximum(a, a.T) + jnp.eye(N, dtype=jnp.float32)
    deg = jnp.sum(a, axis=-1, keepdims=True)
    adj = a / deg

    # Parameters (deterministic synthetic init; gamma/beta/b_gcn nontrivial to
    # exercise the LN affine and GCN bias paths).
    w_lin = jax.random.normal(kwl, (D_IN, D_OUT), dtype=jnp.float32) * 0.1
    w_gcn = jax.random.normal(kwg, (D_OUT, D_OUT), dtype=jnp.float32) * 0.1
    b_gcn = jax.random.normal(kb, (1, D_OUT), dtype=jnp.float32) * 0.1
    gamma = 1.0 + jax.random.normal(kg, (1, D_OUT), dtype=jnp.float32) * 0.1
    beta = jax.random.normal(kbt, (1, D_OUT), dtype=jnp.float32) * 0.1

    out = euc_gc_layer(x, adj, w_lin, w_gcn, b_gcn, gamma, beta)
    out = jax.block_until_ready(out)

    ref = reference(x, adj, w_lin, w_gcn, b_gcn, gamma, beta)
    assert out.shape == (N, D_OUT)
    # Tolerance loosened vs a pure-f32 pipeline because adj and the hidden
    # activations feeding the adj matmul are carried in bf16 (f32 accumulation).
    assert jnp.allclose(out, ref, atol=2e-2, rtol=2e-2), float(
        jnp.max(jnp.abs(out - ref)))

    print("KERNEL_OK")
</pallas_src>

<mosaic_0001>
module attributes {stable_mosaic.version = 11 : i64} {
  func.func @_xw_kernel(%arg0: i32, %arg1: i32, %arg2: memref<128x128xf32, #tpu.memory_space<vmem>>, %arg3: memref<128x128xf32, #tpu.memory_space<vmem>>, %arg4: memref<128x128xbf16, #tpu.memory_space<vmem>>) attributes {dimension_semantics = [#tpu.dimension_semantics<parallel>, #tpu.dimension_semantics<parallel>], iteration_bounds = array<i64: 1, 1>, scalar_prefetch = 0 : i64, scratch_operands = 0 : i64, tpu.core_type = #tpu.core_type<tc>, window_params = [{transform_indices = @transform_0, window_bounds = array<i64: 128, 128>}, {transform_indices = @transform_1, window_bounds = array<i64: 128, 128>}, {transform_indices = @transform_2, window_bounds = array<i64: 128, 128>}]} {
    %c0 = arith.constant 0 : index
    %c0_0 = arith.constant 0 : index
    %0 = vector.load %arg2[%c0, %c0_0] : memref<128x128xf32, #tpu.memory_space<vmem>>, vector<128x128xf32>
    %c0_1 = arith.constant 0 : index
    %c0_2 = arith.constant 0 : index
    %1 = vector.load %arg3[%c0_1, %c0_2] : memref<128x128xf32, #tpu.memory_space<vmem>>, vector<128x128xf32>
    %cst = arith.constant dense<0.000000e+00> : vector<128x128xf32>
    %2 = tpu.matmul %0, %1, %cst {dimension_numbers = #tpu.dot_dimension_numbers<[1], [0], [0], [1], [0, 0, 1, 1], [], []>} : vector<128x128xf32>, vector<128x128xf32>, vector<128x128xf32> -> vector<128x128xf32>
    %3 = arith.truncf %2 : vector<128x128xf32> to vector<128x128xbf16>
    %c0_3 = arith.constant 0 : index
    %c0_4 = arith.constant 0 : index
    %4 = vector.load %arg4[%c0_3, %c0_4] : memref<128x128xbf16, #tpu.memory_space<vmem>>, vector<128x128xbf16>
    tpu.vector_store %arg4[%c0_3, %c0_4], %3 {strides = array<i32>} : memref<128x128xbf16, #tpu.memory_space<vmem>>, vector<128x128xbf16>,
    return
  }
  func.func @transform_0(%arg0: i32, %arg1: i32) -> (i32, i32) {
    %c0_i32 = arith.constant 0 : i32
    %c0_i32_0 = arith.constant 0 : i32
    return %arg0, %c0_i32 : i32, i32
  }
  func.func @transform_1(%arg0: i32, %arg1: i32) -> (i32, i32) {
    %c0_i32 = arith.constant 0 : i32
    %c0_i32_0 = arith.constant 0 : i32
    return %c0_i32, %arg1 : i32, i32
  }
  func.func @transform_2(%arg0: i32, %arg1: i32) -> (i32, i32) {
    %c0_i32 = arith.constant 0 : i32
    return %arg0, %arg1 : i32, i32
  }
}

</mosaic_0001>

<bundles_post_ra>
// kernel: tpu_custom_call.1
= control target key start
LH: loop header
LB: loop body
LE: loop exit
PB: predicated region body
PF: predicated region fallthrough
CT: control target
= control target key end

     0   :  { %7 = vsyncpa [#allocation3], 0  ;;  %s667_s0 = inlined_call_operand.hbm [shape: f32[128,128], index: 0, kind: input, shape index: {}]   ;;  %s668_s1 = inlined_call_operand.hbm [shape: f32[128,128], index: 1, kind: input, shape index: {}]   ;;  %s669_s2 = inlined_call_operand.hbm [shape: bf16[128,128], index: 2, kind: output, shape index: {}]  }
   0x1   :  { %8 = vsyncpa [#allocation6], 0 }
   0x2   :  { %9 = vsyncpa [#allocation4], 0  ;;  %s609_s9 = smov [#allocation2]   ;;  %s537_s13 = scalar_lea.hbm %s667_s0, 2048 }
   0x3   :  { %s15_s10 = sshll.u32 %s609_s9, 4  ;;  %p538_p0 = scmp.ne.s32.totalorder %s667_s0, %s537_s13  ;;  %s16_s10 = int_to_ptr.vmem [resolvable:$true] %s15_s10 }
   0x4   :  { %p541_p1 = scmp.lt.u32.totalorder %s537_s13, %s667_s0 }
   0x6   :  { %p543_p2 = pnand %p541_p1, %p538_p0 }
   0x8   :  { %546 = shalt.err (!%p543_p2)
}
   0x9   :  { %s547_s18 = scalar_lea.vmem %s16_s10, 2048  ;;  %p552_p4 = scmp.lt.s32.totalorder %s16_s10, %s16_s10 }
   0xa   :  { %p548_p3 = scmp.ne.s32.totalorder %s16_s10, %s547_s18  ;;  %p553_p5 = scmp.lt.s32.totalorder %s547_s18, %s547_s18 }
   0xc   :  { %p554_p6 = por %p553_p5, %p552_p4 }
   0xe   :  { %p555_p7 = pnand %p554_p6, %p548_p3 }
  0x10   :  { %558 = shalt.err (!%p555_p7)
}
  0x11   :  { %s610_s19 = smov 128   ;;  %s611_s20 = smov 8  }
  0x12   :  { %21 = dma.hbm_to_vmem [thread:$0]  %s667_s0, 2048, %s16_s10, [#allocation3], %s610_s19, %s610_s19, %s611_s20  }
  0x13   :  { %s612_s23 = smov [#allocation5]   ;;  %s559_s27 = scalar_lea.hbm %s668_s1, 2048 }
  0x14   :  { %s27_s24 = sshll.u32 %s612_s23, 4  ;;  %p560_p8 = scmp.ne.s32.totalorder %s668_s1, %s559_s27  ;;  %s28_s24 = int_to_ptr.vmem [resolvable:$true] %s27_s24 }
  0x15   :  { %p563_p9 = scmp.lt.u32.totalorder %s559_s27, %s668_s1 }
  0x17   :  { %p565_p10 = pnand %p563_p9, %p560_p8 }
  0x19   :  { %568 = shalt.err (!%p565_p10)
}
  0x1a   :  { %s569_s4 = scalar_lea.vmem %s28_s24, 2048  ;;  %p574_p12 = scmp.lt.s32.totalorder %s28_s24, %s28_s24 }
  0x1b   :  { %p570_p11 = scmp.ne.s32.totalorder %s28_s24, %s569_s4  ;;  %p575_p13 = scmp.lt.s32.totalorder %s569_s4, %s569_s4 }
  0x1d   :  { %p576_p0 = por %p575_p13, %p574_p12 }
  0x1f   :  { %p577_p1 = pnand %p576_p0, %p570_p11 }
  0x21   :  { %580 = shalt.err (!%p577_p1)
}
  0x22   :  { %33 = dma.hbm_to_vmem [thread:$0]  %s668_s1, 2048, %s28_s24, [#allocation6], %s610_s19, %s610_s19, %s611_s20  }
  0x23   :  { %603 = dma.done.wait [#allocation3], 2048  }
  0x24   :  { %604 = vsyncadd [#allocation3], 4294965248 }
  0x25   :  { %605 = dma.done.wait [#allocation6], 2048  }
  0x26   :  { %606 = vsyncadd [#allocation6], 4294965248  ;;  %v56_v0 = vld [vmem:[#allocation5] sm:$0xff]  ;;  %v57_v1 = vld [vmem:[#allocation5 + $0x8] sm:$0xff]  ;;  %s613_s1 = smov [#allocation7]  }
  0x27   :  { %v58_v2 = vld [vmem:[#allocation5 + $0x10] sm:$0xff]  ;;  %v482_v3 = vpack.c.bf16 %v57_v1, %v56_v0  ;;  %v59_v4 = vld [vmem:[#allocation5 + $0x18] sm:$0xff]  ;;  %v60_v6 = vld [vmem:[#allocation5 + $0x20] sm:$0xff]  ;;  %s302_s6 = sshll.u32 %s613_s1, 4  ;;  %s303_s6 = int_to_ptr.vmem [resolvable:$true] %s302_s6 }
  0x28   :  { %v486_v5 = vpack.c.bf16 %v59_v4, %v58_v2  ;;  %v61_v7 = vld [vmem:[#allocation5 + $0x28] sm:$0xff]  ;;  %v40_v9 = vld [vmem:[#allocation2] sm:$0xff]  ;;  %v62_v11 = vld [vmem:[#allocation5 + $0x30] sm:$0xff]  ;;  %s581_s7 = scalar_lea.vmem %s303_s6, 1024  ;;  %p586_p3 = scmp.lt.s32.totalorder %s303_s6, %s303_s6 }
  0x29   :  { %483 = vmatprep.subr.bf16.mxu0 %v482_v3  ;;  %514 = vmatprep.subr.bf16.mxu1 %v482_v3  ;;  %v490_v8 = vpack.c.bf16 %v61_v7, %v60_v6  ;;  %v48_v10 = vld [vmem:[#allocation2 + $0x40] sm:$0xff]  ;;  %v63_v12 = vld [vmem:[#allocation5 + $0x38] sm:$0xff]  ;;  %v65_v15 = vld [vmem:[#allocation5 + $0x48] sm:$0xff]  ;;  %p582_p2 = scmp.ne.s32.totalorder %s303_s6, %s581_s7  ;;  %p587_p4 = scmp.lt.s32.totalorder %s581_s7, %s581_s7 }
  0x2a   :  { %485 = vmatpush3.bf16.msra.mxu0 %v482_v3  ;;  %522 = vmatpush3.bf16.msra.mxu1 %v482_v3  ;;  %v494_v13 = vpack.c.bf16 %v63_v12, %v62_v11  ;;  %v64_v14 = vld [vmem:[#allocation5 + $0x40] sm:$0xff]  ;;  %v66_v17 = vld [vmem:[#allocation5 + $0x50] sm:$0xff]  ;;  %v67_v18 = vld [vmem:[#allocation5 + $0x58] sm:$0xff] }
  0x2b   :  { %487 = vmatprep.subr.bf16.mxu0 %v486_v5  ;;  %515 = vmatprep.subr.bf16.mxu1 %v486_v5  ;;  %v498_v16 = vpack.c.bf16 %v65_v15, %v64_v14  ;;  %v502_v19 = vpack.c.bf16 %v67_v18, %v66_v17  ;;  %v68_v20 = vld [vmem:[#allocation5 + $0x60] sm:$0xff]  ;;  %v69_v21 = vld [vmem:[#allocation5 + $0x68] sm:$0xff]  ;;  %v70_v23 = vld [vmem:[#allocation5 + $0x70] sm:$0xff]  ;;  %p588_p5 = por %p587_p4, %p586_p3 }
  0x2c   :  { %458 = vmatprep.mubr.f32.mxu0 %v40_v9  ;;  %470 = vmatprep.mubr.f32.mxu1 %v48_v10  ;;  %v506_v22 = vpack.c.bf16 %v69_v21, %v68_v20  ;;  %v71_v24 = vld [vmem:[#allocation5 + $0x78] sm:$0xff]  ;;  %v41_v26 = vld [vmem:[#allocation2 + $0x8] sm:$0xff]  ;;  %v42_v28 = vld [vmem:[#allocation2 + $0x10] sm:$0xff] }
  0x2d   :  { %v510_v25 = vpack.c.bf16 %v71_v24, %v70_v23  ;;  %v49_v27 = vld [vmem:[#allocation2 + $0x48] sm:$0xff]  ;;  %v50_v29 = vld [vmem:[#allocation2 + $0x50] sm:$0xff]  ;;  %v43_v30 = vld [vmem:[#allocation2 + $0x18] sm:$0xff]  ;;  %p589_p6 = pnand %p588_p5, %p582_p2 }
  0x2e   :  { %489 = vmatpush3.bf16.msra.mxu0 %v486_v5  ;;  %523 = vmatpush3.bf16.msra.mxu1 %v486_v5  ;;  %v51_v31 = vld [vmem:[#allocation2 + $0x58] sm:$0xff]  ;;  %v44_v32 = vld [vmem:[#allocation2 + $0x20] sm:$0xff]  ;;  %v45_v34 = vld [vmem:[#allocation2 + $0x28] sm:$0xff] }
  0x2f   :  { %491 = vmatprep.subr.bf16.mxu0 %v490_v8  ;;  %516 = vmatprep.subr.bf16.mxu1 %v490_v8  ;;  %v52_v33 = vld [vmem:[#allocation2 + $0x60] sm:$0xff]  ;;  %v53_v35 = vld [vmem:[#allocation2 + $0x68] sm:$0xff]  ;;  %v46_v36 = vld [vmem:[#allocation2 + $0x30] sm:$0xff] }
  0x30   :  { %v54_v37 = vld [vmem:[#allocation2 + $0x70] sm:$0xff]  ;;  %v47_v38 = vld [vmem:[#allocation2 + $0x38] sm:$0xff] }
  0x31   :  { %v55_v39 = vld [vmem:[#allocation2 + $0x78] sm:$0xff] }
  0x32   :  { %493 = vmatpush3.bf16.msra.mxu0 %v490_v8  ;;  %524 = vmatpush3.bf16.msra.mxu1 %v490_v8 }
  0x33   :  { %495 = vmatprep.subr.bf16.mxu0 %v494_v13  ;;  %517 = vmatprep.subr.bf16.mxu1 %v494_v13 }
  0x36   :  { %497 = vmatpush3.bf16.msra.mxu0 %v494_v13  ;;  %525 = vmatpush3.bf16.msra.mxu1 %v494_v13 }
  0x37   :  { %499 = vmatprep.subr.bf16.mxu0 %v498_v16  ;;  %518 = vmatprep.subr.bf16.mxu1 %v498_v16 }
  0x3a   :  { %501 = vmatpush3.bf16.msra.mxu0 %v498_v16  ;;  %526 = vmatpush3.bf16.msra.mxu1 %v498_v16 }
  0x3b   :  { %503 = vmatprep.subr.bf16.mxu0 %v502_v19  ;;  %519 = vmatprep.subr.bf16.mxu1 %v502_v19 }
  0x3e   :  { %505 = vmatpush3.bf16.msra.mxu0 %v502_v19  ;;  %527 = vmatpush3.bf16.msra.mxu1 %v502_v19 }
  0x3f   :  { %507 = vmatprep.subr.bf16.mxu0 %v506_v22  ;;  %520 = vmatprep.subr.bf16.mxu1 %v506_v22 }
  0x42   :  { %509 = vmatpush3.bf16.msra.mxu0 %v506_v22  ;;  %528 = vmatpush3.bf16.msra.mxu1 %v506_v22 }
  0x43   :  { %511 = vmatprep.subr.bf16.mxu0 %v510_v25  ;;  %521 = vmatprep.subr.bf16.mxu1 %v510_v25 }
  0x46   :  { %513 = vmatpush3.bf16.msra.mxu0 %v510_v25  ;;  %529 = vmatpush3.bf16.msra.mxu1 %v510_v25 }
  0x49   :  { %459 = vmatmul.mubr.f32.vlgmr.msra.gmra.mrb[0].mxu0 %v41_v26  ;;  %471 = vmatmul.mubr.f32.vlgmr.msra.gmra.mrb[0].mxu1 %v49_v27 }
  0x4a   :  { %461 = vmatprep.mubr.f32.mxu0 %v42_v28  ;;  %473 = vmatprep.mubr.f32.mxu1 %v50_v29 }
  0x4d   :  { %462 = vmatmul.mubr.f32.gmra.mrb[2].mxu0 %v43_v30  ;;  %474 = vmatmul.mubr.f32.gmra.mrb[2].mxu1 %v51_v31 }
  0x4e   :  { %464 = vmatprep.mubr.f32.mxu0 %v44_v32  ;;  %476 = vmatprep.mubr.f32.mxu1 %v52_v33 }
  0x51   :  { %465 = vmatmul.mubr.f32.gmra.mrb[4].mxu0 %v45_v34  ;;  %477 = vmatmul.mubr.f32.gmra.mrb[4].mxu1 %v53_v35 }
  0x52   :  { %467 = vmatprep.mubr.f32.mxu0 %v46_v36  ;;  %479 = vmatprep.mubr.f32.mxu1 %v54_v37 }
  0x55   :  { %468 = vmatmul.mubr.f32.gmra.mrb[6].mxu0 %v47_v38  ;;  %480 = vmatmul.mubr.f32.gmra.mrb[6].mxu1 %v55_v39 }
 0x11c   :  { %v460_v40 = vpop.f32.mrb[0].mxu0  ;;  %v472_v41 = vpop.f32.mrb[0].mxu1 }
 0x11d   :  { %v138_v42 = vpop.f32.mrb[1].mxu0  ;;  %v178_v43 = vpop.f32.mrb[1].mxu1 }
 0x11e   :  { %v350_v44 = vpack.c.bf16 %v460_v40, %v138_v42  ;;  %v370_v45 = vpack.c.bf16 %v472_v41, %v178_v43 }
 0x120   :  { %351 = vst [vmem:[#allocation7] sm:$0xff] %v350_v44   ;;  %390 = vst [vmem:[#allocation7 + $0x20] sm:$0xff] %v370_v45   ;;  %v463_v46 = vpop.f32.mrb[2].mxu0  ;;  %v475_v47 = vpop.f32.mrb[2].mxu1 }
 0x121   :  { %v148_v48 = vpop.f32.mrb[3].mxu0  ;;  %v188_v49 = vpop.f32.mrb[3].mxu1 }
 0x122   :  { %v355_v50 = vpack.c.bf16 %v463_v46, %v148_v48  ;;  %v375_v51 = vpack.c.bf16 %v475_v47, %v188_v49 }
 0x124   :  { %387 = vst [vmem:[#allocation7 + $0x8] sm:$0xff] %v355_v50   ;;  %391 = vst [vmem:[#allocation7 + $0x28] sm:$0xff] %v375_v51   ;;  %v466_v52 = vpop.f32.mrb[4].mxu0  ;;  %v478_v53 = vpop.f32.mrb[4].mxu1 }
 0x125   :  { %v158_v54 = vpop.f32.mrb[5].mxu0  ;;  %v198_v55 = vpop.f32.mrb[5].mxu1 }
 0x126   :  { %v360_v56 = vpack.c.bf16 %v466_v52, %v158_v54  ;;  %v380_v57 = vpack.c.bf16 %v478_v53, %v198_v55 }
 0x128   :  { %388 = vst [vmem:[#allocation7 + $0x10] sm:$0xff] %v360_v56   ;;  %392 = vst [vmem:[#allocation7 + $0x30] sm:$0xff] %v380_v57   ;;  %v469_v58 = vpop.f32.mrb[6].mxu0  ;;  %v481_v59 = vpop.f32.mrb[6].mxu1 }
 0x129   :  { %v168_v60 = vpop.f32.mrb[7].mxu0  ;;  %v208_v61 = vpop.f32.mrb[7].mxu1 }
 0x12a   :  { %v365_v62 = vpack.c.bf16 %v469_v58, %v168_v60  ;;  %v385_v63 = vpack.c.bf16 %v481_v59, %v208_v61 }
 0x12c   :  { %389 = vst [vmem:[#allocation7 + $0x18] sm:$0xff] %v365_v62   ;;  %393 = vst [vmem:[#allocation7 + $0x38] sm:$0xff] %v385_v63  }
 0x12d   :  { %592 = shalt.err (!%p589_p6)
}
 0x12e   :  { %s593_s10 = scalar_lea.hbm %s669_s2, 1024 }
 0x12f   :  { %p594_p7 = scmp.ne.s32.totalorder %s669_s2, %s593_s10  ;;  %p597_p8 = scmp.lt.u32.totalorder %s593_s10, %s669_s2 }
 0x131   :  { %p599_p9 = pnand %p597_p8, %p594_p7 }
 0x133   :  { %602 = shalt.err (!%p599_p9)
}
 0x134   :  { %s614_s15 = smov 64   ;;  %s615_s16 = smov 4  }
 0x135   :  { %308 = dma.vmem_to_hbm [thread:$0]  %s303_s6, 1024, %s669_s2, [#allocation4], %s614_s15, %s614_s15, %s615_s16  }
 0x136   :  { %607 = dma.done.wait [#allocation4], 1024  }
 0x137   :  { %608 = vsyncadd [#allocation4], 4294966272 }
 0x138   :  { %312 = vsyncpa [#allocation3], 1 }
 0x139   :  { %313 = vsyncpa [#allocation6], 1 }
 0x13a   :  { %314 = vsyncpa [#allocation4], 1 }

</bundles_post_ra>
